<compile_context>
chip_gen: v5e
topology: v5e:2x2
jax: 0.10.0
libtpu: 0.0.40
codegen_flags: <defaults>
</compile_context>

<pallas_src>
import jax
import jax.numpy as jnp
from jax.experimental import pallas as pl
from jax.experimental.pallas import tpu as pltpu

_CLAMP_MIN = 1e-08
_CLAMP_MAX = 1e08


def _ordinal_kernel(even_ref, odd_ref, out_ref):
    """even_ref / odd_ref / out_ref: (TR, TL) VMEM tiles.

    prob = softmax([clamp(e), clamp(o)])[1] == sigmoid(o - e)
         == 1 / (1 + exp(e - o)).
    exp overflow for e >> o saturates to +inf -> prob 0 (correct limit, no NaN).
    """
    e = jnp.clip(even_ref[...].astype(jnp.float32), _CLAMP_MIN, _CLAMP_MAX)
    o = jnp.clip(odd_ref[...].astype(jnp.float32), _CLAMP_MIN, _CLAMP_MAX)
    # exp(e - o) directly (no extra negate); exact reciprocal to hold 1e-5 tol.
    p = pl.reciprocal(1.0 + jnp.exp(e - o), approx=False)
    out_ref[...] = p.astype(out_ref.dtype)


def ordinal_regression_layer(x, *, row_tile=None, lane_tile=None,
                             max_lane_tile=4096,
                             vmem_budget_bytes=24 << 20):
    """x: (N, C, H, W) float array (NCHW, matching PyTorch).

    Returns prob of shape (N, C//2, H, W)."""
    N, C, H, W = x.shape
    assert C % 2 == 0, "channel count must be even"
    ord_num = C // 2
    R = N * ord_num          # output rows
    HW = H * W               # lane (last) dim
    itemsize = int(jnp.dtype(x.dtype).itemsize)
    # sublane packing: 8 rows for f32, 16 for bf16, 32 for int8
    pack = max(8, 32 // max(itemsize, 1))

    # ---- tile selection -------------------------------------------------
    # Lane tile: full dim when small (always legal), else a multiple of 128
    # (ragged tail blocks are masked by Pallas).
    if lane_tile is None:
        TL = HW if HW <= max_lane_tile else max_lane_tile
    else:
        TL = HW if HW <= lane_tile else lane_tile

    # Row tile: full dim, or a multiple of the sublane packing, sized so the
    # double-buffered footprint (2 inputs + 1 output, x2 buffers) stays within
    # vmem_budget_bytes.
    if row_tile is None:
        budget_rows = max(pack, vmem_budget_bytes // (6 * TL * itemsize))
        if R <= budget_rows:
            TR = R
        else:
            TR = max(pack, (min(budget_rows, 512) // pack) * pack)
    else:
        TR = R if R <= row_tile else row_tile

    # v7x: both TensorCores only get work if the grid has >= 2 parallel blocks.
    if (row_tile is None and lane_tile is None
            and pl.cdiv(R, TR) * pl.cdiv(HW, TL) < 2):
        if R >= 2 * pack:
            TR = max(pack, ((TR // 2) // pack) * pack)
        elif HW >= 256 and HW % 256 == 0:
            TL = HW // 2

    grid = (pl.cdiv(R, TR), pl.cdiv(HW, TL))

    # ---- views ----------------------------------------------------------
    # Free, contiguous reshape: channel c = 2k + parity maps to
    # (row=n*ord_num+k, parity, 0, h*W+w).  Dim 2 is a dummy size-1 dim so the
    # block's last two dims are (1(full), TL) under the (8,128) tiling rule.
    x4 = x.reshape(R, 2, 1, HW)

    even_spec = pl.BlockSpec((TR, None, None, TL), lambda i, j: (i, 0, 0, j))
    odd_spec = pl.BlockSpec((TR, None, None, TL), lambda i, j: (i, 1, 0, j))
    out_spec = pl.BlockSpec((TR, TL), lambda i, j: (i, j))

    # Explicit scoped-VMEM limit: actual double-buffered need + headroom,
    # clipped to stay within every generation's physical VMEM (v7x: 64 MiB/TC).
    vmem_need = 2 * (2 + 1) * TR * TL * itemsize
    vmem_limit = int(min(max(vmem_need + (8 << 20), 16 << 20), 40 << 20))

    # Advisory cost hint for XLA scheduling around this memory-bound call.
    cost = pl.CostEstimate(
        flops=6 * R * HW,
        transcendentals=2 * R * HW,                      # exp + reciprocal
        bytes_accessed=3 * R * HW * itemsize,            # 2x read + 1x write
    )

    prob_flat = pl.pallas_call(
        _ordinal_kernel,
        out_shape=jax.ShapeDtypeStruct((R, HW), x.dtype),
        grid_spec=pltpu.PrefetchScalarGridSpec(
            num_scalar_prefetch=0,
            grid=grid,
            in_specs=[even_spec, odd_spec],
            out_specs=out_spec,
        ),
        compiler_params=pltpu.CompilerParams(
            dimension_semantics=("parallel", "parallel"),
            vmem_limit_bytes=vmem_limit,
        ),
        cost_estimate=cost,
    )(x4, x4)

    return prob_flat.reshape(N, ord_num, H, W)


def ordinal_head(feat):
    """RVMDE head: prob via the Pallas kernel, label via a cheap jnp reduce
    (prob >= 0.5  <=>  odd_logit >= even_logit)."""
    prob = ordinal_regression_layer(feat)
    N, _, H, W = feat.shape
    label = jnp.sum((prob >= 0.5).astype(jnp.int32), axis=1).reshape(N, 1, H, W)
    return prob, label


def _reference(x):
    """Pure-JAX reference mirroring the PyTorch code exactly (softmax form)."""
    N, C, H, W = x.shape
    ord_num = C // 2
    label_0 = x[:, 0::2, :, :].reshape(N, 1, ord_num, H, W)
    label_1 = x[:, 1::2, :, :].reshape(N, 1, ord_num, H, W)
    label = jnp.concatenate((label_0, label_1), axis=1)
    label = jnp.clip(label, _CLAMP_MIN, _CLAMP_MAX)
    label_ord = jax.nn.softmax(label, axis=1)
    return label_ord[:, 1, :, :, :]


# TODO(synk): the RVMDE backbones (ResNet102 / ResNet_radar), 1x1 conv stacks,
# Dropout2d and bilinear F.interpolate are standard XLA-lowered ops and are not
# reimplemented as Pallas kernels; only the ordinal-regression head is.

if __name__ == "__main__":
    key = jax.random.PRNGKey(0)
    k1, k2, k3 = jax.random.split(key, 3)

    # Test 1: small feature map, auto-chosen tiles, f32.
    x1 = jax.random.normal(k1, (2, 4, 16, 16), dtype=jnp.float32)
    out1 = jax.block_until_ready(ordinal_regression_layer(x1))
    ref1 = _reference(x1)
    assert out1.shape == (2, 2, 16, 16)
    assert jnp.allclose(out1, ref1, atol=1e-5, rtol=1e-5), "test1 mismatch"

    # Test 2: ragged tiles on both axes (masked tail blocks), f32.
    x2 = jax.random.normal(k2, (2, 12, 10, 20), dtype=jnp.float32)
    out2 = jax.block_until_ready(
        ordinal_regression_layer(x2, row_tile=8, lane_tile=128))
    ref2 = _reference(x2)
    assert out2.shape == (2, 6, 10, 20)
    assert jnp.allclose(out2, ref2, atol=1e-5, rtol=1e-5), "test2 mismatch"

    # Test 3: bf16 I/O path (halves HBM bytes for this bandwidth-bound op).
    x3 = jax.random.normal(k3, (2, 4, 16, 16), dtype=jnp.float32).astype(jnp.bfloat16)
    out3 = jax.block_until_ready(ordinal_regression_layer(x3))
    ref3 = _reference(x3.astype(jnp.float32))
    assert out3.dtype == jnp.bfloat16
    assert jnp.allclose(out3.astype(jnp.float32), ref3,
                        atol=2e-2, rtol=2e-2), "test3 mismatch"

    # Full head output (prob, label) as in RVMDE.forward.
    prob, label = ordinal_head(x1)
    jax.block_until_ready(label)
    assert label.shape == (2, 1, 16, 16)

    print("KERNEL_OK")
</pallas_src>

<mosaic_0001>
module attributes {stable_mosaic.version = 11 : i64} {
  func.func @_ordinal_kernel(%arg0: i32, %arg1: i32, %arg2: memref<4x1x1x128xf32, #tpu.memory_space<vmem>>, %arg3: memref<4x1x1x128xf32, #tpu.memory_space<vmem>>, %arg4: memref<4x128xf32, #tpu.memory_space<vmem>>) attributes {dimension_semantics = [#tpu.dimension_semantics<parallel>, #tpu.dimension_semantics<parallel>], iteration_bounds = array<i64: 1, 2>, scalar_prefetch = 0 : i64, scratch_operands = 0 : i64, tpu.core_type = #tpu.core_type<tc>, window_params = [{transform_indices = @transform_0, window_bounds = array<i64: 4, 1, 1, 128>}, {transform_indices = @transform_1, window_bounds = array<i64: 4, 1, 1, 128>}, {transform_indices = @transform_2, window_bounds = array<i64: 4, 128>}]} {
    %c0 = arith.constant 0 : index
    %c0_0 = arith.constant 0 : index
    %c0_1 = arith.constant 0 : index
    %c0_2 = arith.constant 0 : index
    %0 = vector.load %arg2[%c0, %c0_0, %c0_1, %c0_2] : memref<4x1x1x128xf32, #tpu.memory_space<vmem>>, vector<4x1x1x128xf32>
    %1 = vector.shape_cast %0 : vector<4x1x1x128xf32> to vector<4x128xf32>
    %cst = arith.constant 9.99999993E-9 : f32
    %cst_3 = arith.constant 1.000000e+08 : f32
    %2 = vector.broadcast %cst : f32 to vector<4x128xf32>
    %3 = arith.maximumf %2, %1 : vector<4x128xf32>
    %4 = vector.broadcast %cst_3 : f32 to vector<4x128xf32>
    %5 = arith.minimumf %4, %3 : vector<4x128xf32>
    %c0_4 = arith.constant 0 : index
    %c0_5 = arith.constant 0 : index
    %c0_6 = arith.constant 0 : index
    %c0_7 = arith.constant 0 : index
    %6 = vector.load %arg3[%c0_4, %c0_5, %c0_6, %c0_7] : memref<4x1x1x128xf32, #tpu.memory_space<vmem>>, vector<4x1x1x128xf32>
    %7 = vector.shape_cast %6 : vector<4x1x1x128xf32> to vector<4x128xf32>
    %cst_8 = arith.constant 9.99999993E-9 : f32
    %cst_9 = arith.constant 1.000000e+08 : f32
    %8 = vector.broadcast %cst_8 : f32 to vector<4x128xf32>
    %9 = arith.maximumf %8, %7 : vector<4x128xf32>
    %10 = vector.broadcast %cst_9 : f32 to vector<4x128xf32>
    %11 = arith.minimumf %10, %9 : vector<4x128xf32>
    %12 = arith.subf %5, %11 : vector<4x128xf32>
    %13 = math.exp %12 : vector<4x128xf32>
    %cst_10 = arith.constant 1.000000e+00 : f32
    %14 = vector.broadcast %cst_10 : f32 to vector<4x128xf32>
    %15 = arith.addf %14, %13 : vector<4x128xf32>
    %16 = tpu.reciprocal %15 : vector<4x128xf32> -> vector<4x128xf32>
    %c0_11 = arith.constant 0 : index
    %c0_12 = arith.constant 0 : index
    %17 = vector.load %arg4[%c0_11, %c0_12] : memref<4x128xf32, #tpu.memory_space<vmem>>, vector<4x128xf32>
    tpu.vector_store %arg4[%c0_11, %c0_12], %16 {strides = array<i32>} : memref<4x128xf32, #tpu.memory_space<vmem>>, vector<4x128xf32>,
    return
  }
  func.func @transform_0(%arg0: i32, %arg1: i32) -> (i32, i32, i32, i32) {
    %c0_i32 = arith.constant 0 : i32
    %c0_i32_0 = arith.constant 0 : i32
    %c0_i32_1 = arith.constant 0 : i32
    return %arg0, %c0_i32, %c0_i32_0, %arg1 : i32, i32, i32, i32
  }
  func.func @transform_1(%arg0: i32, %arg1: i32) -> (i32, i32, i32, i32) {
    %c1_i32 = arith.constant 1 : i32
    %c0_i32 = arith.constant 0 : i32
    %c0_i32_0 = arith.constant 0 : i32
    return %arg0, %c1_i32, %c0_i32, %arg1 : i32, i32, i32, i32
  }
  func.func @transform_2(%arg0: i32, %arg1: i32) -> (i32, i32) {
    %c0_i32 = arith.constant 0 : i32
    return %arg0, %arg1 : i32, i32
  }
}

</mosaic_0001>

<bundles_post_ra>
// kernel: tpu_custom_call.1
= control target key start
LH: loop header
LB: loop body
LE: loop exit
PB: predicated region body
PF: predicated region fallthrough
CT: control target
= control target key end

     0   :  { %s897_s0 = inlined_call_operand.hbm [shape: f32[4,2,1,256], index: 0, kind: input, shape index: {}]   ;;  %s898_s1 = inlined_call_operand.hbm [shape: f32[4,2,1,256], index: 1, kind: input, shape index: {}]   ;;  %s899_s2 = inlined_call_operand.hbm [shape: f32[4,256], index: 2, kind: output, shape index: {}]  }
   0x1   :  { %900 = sst [smem:[#allocation11_spill]] %s897_s0 }
   0x2   :  { %7 = vsyncpa [#allocation3], 0 }
   0x3   :  { %9 = vsyncpa [#allocation3 + $0x1], 0 }
   0x4   :  { %10 = vsyncpa [#allocation6], 0 }
   0x5   :  { %12 = vsyncpa [#allocation6 + $0x1], 0 }
   0x6   :  { %13 = vsyncpa [#allocation4], 0 }
   0x7   :  { %15 = vsyncpa [#allocation4 + $0x1], 0  ;;  %s729_s9 = smov 0   ;;  %s731_s10 = smov 0  }
   0x8   :  { %s733_s11 = smov 0   ;;  %s735_s12 = smov 0  }
   0x9   :  { %s737_s13 = smov 0   ;;  %s739_s14 = smov 0  }
   0xa LB: > { %s463_s15 = sadd.s32 4294967295, %s709_s14   ;;  %s464_s16 = sadd.s32 4294967294, %s709_s14   ;;  %s709_s14 = sphi %s739_s14, %s21_s14   ;;  %s705_s13 = sphi %s737_s13, %s917_s13   ;;  %s701_s12 = sphi %s735_s12, %s916_s12   ;;  %s697_s11 = sphi %s733_s11, %s915_s11   ;;  %s693_s10 = sphi %s731_s10, %s914_s10   ;;  %s689_s9 = sphi %s729_s9, %s913_s9  }
   0xb   : > { %s30_s17 = sadd.s32 1, %s705_s13  ;;  %s42_s18 = sadd.s32 1, %s697_s11 }
   0xc   : > { %p31_p0 = scmp.ge.s32.totalorder %s30_s17, 2  ;;  %p49_p1 = scmp.ne.s32.totalorder %s697_s11, %s693_s10 }
   0xd   : > { %p50_p2 = scmp.eq.s32.totalorder %s709_s14, 0  ;;  %p55_p3 = scmp.ne.s32.totalorder %s693_s10, %s689_s9 }
   0xe   : > { %s919_s17 = smov (%p31_p0, %s30_s17), 0  ;;  %p56_p5 = scmp.eq.s32.totalorder %s463_s15, 0 }
   0xf   : > { %p770_p4 = por %p50_p2, %p49_p1  ;;  %s38_s20 = ssub.s32 %s705_s13, %s919_s17 }
  0x10   : > { %p109_p6 = scmp.eq.s32.totalorder %s463_s15, 1  ;;  %p40_p7 = scmp.eq.s32.totalorder %s38_s20, 0 }
  0x11   : > { %p776_p8 = por %p56_p5, %p55_p3  ;;  %p115_p10 = scmp.eq.s32.totalorder %s464_s16, 1 }
  0x12   : > { %p780_p9 = por %p109_p6, %p49_p1  ;;  %p466_p12 = scmp.ge.s32.totalorder %s709_s14, 2 }
  0x13   : > { %s785_s23 = scalar_select %p40_p7, %s697_s11, %s42_s18  }
  0x14   : > { %p787_p11 = por %p115_p10, %p55_p3  ;;  %p494_p13 = scmp.lt.s32.totalorder %s709_s14, 2 }
  0x15   : > { %s794_s25 = sand.u32 1, %s697_s11   ;;  %s905_s0 = sld [smem:[#allocation11_spill]] }
  0x16   : > { %s467_s26 = sshll.u32 %s794_s25, 2  ;;  %p803_p0 = pnand %p494_p13, %p770_p4 }
  0x17   : > { %s139_s3 = scalar_lea.vmem [#allocation2], %s467_s26  ;;  %p469_p1 = scmp.ge.s32.totalorder %s709_s14, 1 }
  0x18   : > { %s148_s4 = sshll.u32 %s139_s3, 4  ;;  %s136_s6 = scalar_lea.sflag [#allocation3], %s794_s25  ;;  %s149_s4 = int_to_ptr.vmem [resolvable:$true] %s148_s4 }
  0x19   : > { %s711_s7 = smov 64   ;;  %s712_s8 = smov 16  }
  0x1a   : > { %s713_s15 = smov 1   ;;  %p180_p2 = scmp.lt.s32.totalorder %s709_s14, 3 }
  0x1b   : > { %s145_s29 = scalar_lea.hbm %s905_s0, %s705_s13  ;;  %s395_s20 = scalar_lea.hbm %s898_s1, %s705_s13 }
  0x1c   : > { %s146_s30 = sshll.u32 %s145_s29, 4  ;;  %p181_p3 = pnand %p469_p1, %p180_p2  ;;  %s147_s30 = int_to_ptr.hbm [resolvable:$true] %s146_s30 }
  0x1d   : > { %486 = dma.hbm_to_vmem [thread:$0]  (!%p803_p0), %s147_s30, 64, %s149_s4, %s136_s6, %s711_s7, %s712_s8, %s713_s15  }
  0x1e   : > { %s396_s19 = scalar_lea.hbm %s395_s20, 2  ;;  %s162_s28 = scalar_lea.vmem [#allocation5], %s467_s26 }
  0x1f   : > { %s170_s27 = sshll.u32 %s396_s19, 4  ;;  %s172_s29 = sshll.u32 %s162_s28, 4  ;;  %s171_s27 = int_to_ptr.hbm [resolvable:$true] %s170_s27  ;;  %s173_s29 = int_to_ptr.vmem [resolvable:$true] %s172_s29 }
  0x20   : > { %s159_s3 = scalar_lea.sflag [#allocation6], %s794_s25  ;;  %184 = sbr.rel (%p181_p3) target bundleno = 92 (0x5c), region = 28 }
  0x21   : > { %489 = dma.hbm_to_vmem [thread:$0]  (!%p803_p0), %s171_s27, 64, %s173_s29, %s159_s3, %s711_s7, %s712_s8, %s713_s15  }
  0x22   : > { %s820_s0 = sand.u32 (!%p181_p3), 1, %s693_s10  }
  0x23   : > { %s823_s30 = sshll.u32 (!%p181_p3), %s820_s0, 2  ;;  %s187_s4 = scalar_lea.sflag (!%p181_p3), [#allocation3], %s820_s0 }
  0x24   : > { %s190_s6 = scalar_lea.vmem (!%p181_p3), [#allocation2], %s823_s30 }
  0x25   : > { %676 = dma.done.wait (%p776_p8), %s187_s4, 64  }
  0x26   : > { %678 = vsyncadd (%p776_p8), %s187_s4, 4294967232  ;;  %s197_s25 = scalar_lea.sflag [#allocation6], %s820_s0  ;;  %s200_s26 = scalar_lea.vmem [#allocation5], %s823_s30 }
  0x27   : > { %680 = dma.done.wait (%p776_p8), %s197_s25, 64  }
  0x28   : > { %682 = vsyncadd (%p776_p8), %s197_s25, 4294967232  ;;  %v229_v0 = vld [vmem:[%s190_s6] sm:$0x1]  ;;  %v241_v1 = vld [vmem:[%s200_s26] sm:$0x1]  ;;  %s474_s21 = sshll.u32 %s701_s12, 2 }
  0x29   : > { %v230_v2 = vld [vmem:[%s190_s6 + $0x1] sm:$0x1]  ;;  %v233_v3 = vmax.f32 %v229_v0, 1e-08  ;;  %v245_v4 = vmax.f32 %v241_v1, 1e-08  ;;  %s352_s8 = scalar_lea.hbm %s899_s2, %s474_s21 }
  0x2a   : > { %v234_v5 = vmax.f32 %v230_v2, 1e-08  ;;  %v242_v6 = vld [vmem:[%s200_s26 + $0x1] sm:$0x1]  ;;  %v231_v7 = vld [vmem:[%s190_s6 + $0x2] sm:$0x1] }
  0x2b   : > { %v243_v8 = vld [vmem:[%s200_s26 + $0x2] sm:$0x1]  ;;  %v237_v9 = vmin.f32 %v233_v3, 1e+08  ;;  %v249_v10 = vmin.f32 %v245_v4, 1e+08 }
  0x2c   : > { %v238_v11 = vmin.f32 %v234_v5, 1e+08  ;;  %v246_v12 = vmax.f32 %v242_v6, 1e-08  ;;  %v235_v13 = vmax.f32 %v231_v7, 1e-08 }
  0x2d   : > { %v247_v14 = vmax.f32 %v243_v8, 1e-08  ;;  %v253_v15 = vsub.f32 %v237_v9, %v249_v10  ;;  %v232_v16 = vld [vmem:[%s190_s6 + $0x3] sm:$0x1]  ;;  %v244_v17 = vld [vmem:[%s200_s26 + $0x3] sm:$0x1] }
  0x2e   : > { %v250_v18 = vmin.f32 %v246_v12, 1e+08  ;;  %v239_v19 = vmin.f32 %v235_v13, 1e+08  ;;  %v236_v22 = vmax.f32 %v232_v16, 1e-08 }
  0x2f   : > { %v251_v20 = vmin.f32 %v247_v14, 1e+08  ;;  %v257_v21 = vmul.f32 1.442695, %v253_v15  ;;  %v248_v23 = vmax.f32 %v244_v17, 1e-08 }
  0x30   : > { %v254_v24 = vsub.f32 %v238_v11, %v250_v18  ;;  %v240_v26 = vmin.f32 %v236_v22, 1e+08  ;;  %s226_s15 = scalar_lea.vmem [#allocation7], %s823_s30  ;;  %s356_s18 = sshll.u32 %s352_s8, 4  ;;  %s357_s18 = int_to_ptr.hbm [resolvable:$true] %s356_s18 }
  0x31   : > { %v255_v25 = vsub.f32 %v239_v19, %v251_v20  ;;  %547 = vpow2.f32 %v257_v21  ;;  %v252_v27 = vmin.f32 %v248_v23, 1e+08  ;;  %s354_s16 = sshll.u32 %s226_s15, 4  ;;  %s340_s20 = scalar_lea.sflag [#allocation4], %s820_s0  ;;  %s355_s16 = int_to_ptr.vmem [resolvable:$true] %s354_s16 }
  0x32   : > { %v259_v28 = vmul.f32 1.442695, %v254_v24  ;;  %s637_s19 = sshra.s32 %s357_s18, 4  ;;  %s643_s29 = scalar_lea.hbm %s899_s2, 8  ;;  %s638_s19 = int_to_ptr.hbm [resolvable:$true] %s637_s19 }
  0x33   : > { %v261_v29 = vmul.f32 1.442695, %v255_v25  ;;  %v256_v30 = vsub.f32 %v240_v26, %v252_v27  ;;  %s639_s27 = scalar_lea.hbm %s638_s19, 4  ;;  %p644_p7 = scmp.lt.s32.totalorder %s638_s19, %s899_s2 }
  0x34   : > { %549 = vpow2.f32 %v259_v28  ;;  %p640_p4 = scmp.ne.s32.totalorder %s638_s19, %s639_s27  ;;  %p645_p8 = scmp.lt.s32.totalorder %s643_s29, %s639_s27 }
  0x35   : > { %551 = vpow2.f32 %v261_v29  ;;  %v263_v31 = vmul.f32 1.442695, %v256_v30 }
  0x36   : > { %p641_p5 = pnand %p640_p4, %p780_p9  ;;  %p646_p10 = por %p645_p8, %p644_p7 }
  0x37   : > { %v548_v32 = vpop.eup %547  ;;  %553 = vpow2.f32 %v263_v31 }
  0x38   : > { %v265_v33 = vadd.f32 1.0, %v548_v32  ;;  %p642_p6 = pneg %p641_p5 }
  0x3a   : > { %v550_v34 = vpop.eup %549  ;;  %555 = vrcp.f32 %v265_v33  ;;  %v278_v41 = vand.u32 2147483647, %v265_v33  ;;  %v280_v42 = vand.u32 2147483648, %v265_v33  ;;  %vm274_vm0 = vweird.f32 %v265_v33  ;;  %p647_p13 = pnand %p646_p10, %p642_p6 }
  0x3b   : > { %v552_v35 = vpop.eup %551  ;;  %v266_v36 = vadd.f32 1.0, %v550_v34 }
  0x3c   : > { %v267_v37 = vadd.f32 1.0, %v552_v35  ;;  %vm837_vm2 = vcmp.eq.f32.partialorder %v278_v41, 8.507059e+37  ;;  %v281_v50 = vor.u32 1.1754944e-38, %v280_v42 }
  0x3d   : > { %v554_v38 = vpop.eup %553  ;;  %557 = vrcp.f32 %v266_v36  ;;  %v292_v44 = vand.u32 2147483647, %v266_v36  ;;  %v294_v47 = vand.u32 2147483648, %v266_v36  ;;  %vm288_vm3 = vweird.f32 %v266_v36 }
  0x3e   : > { %559 = vrcp.f32 %v267_v37  ;;  %v268_v39 = vadd.f32 1.0, %v554_v38  ;;  %v308_v52 = vand.u32 2147483648, %v267_v37  ;;  %vm302_vm4 = vweird.f32 %v267_v37 }
  0x3f   : > { %vm845_vm7 = vcmp.eq.f32.partialorder %v292_v44, 8.507059e+37  ;;  %v306_v58 = vand.u32 2147483647, %v267_v37  ;;  %v295_v61 = vor.u32 1.1754944e-38, %v294_v47 }
  0x40   : > { %v556_v40 = vpop.eup %555  ;;  %561 = vrcp.f32 %v268_v39  ;;  %v309_v0 = vor.u32 1.1754944e-38, %v308_v52  ;;  %vm316_vm9 = vweird.f32 %v268_v39  ;;  %v320_v4 = vand.u32 2147483647, %v268_v39 }
  0x41   : > { %v270_v43 = vmul.f32 %v556_v40, %v265_v33  ;;  %vm275_vm1 = vweird.f32 %v556_v40  ;;  %v322_v5 = vand.u32 2147483648, %v268_v39  ;;  %vm307_vm13 = vcmp.eq.f32.partialorder %v306_v58, 8.507059e+37 }
  0x42   : > { %vm841_vm5 = vmor %vm274_vm0, %vm275_vm1  ;;  %vm321_vm15 = vcmp.eq.f32.partialorder %v320_v4, 8.507059e+37 }
  0x43   : > { %v558_v45 = vpop.eup %557  ;;  %v271_v46 = vsub.f32 1.0, %v270_v43  ;;  %v323_v14 = vor.u32 1.1754944e-38, %v322_v5 }
  0x44   : > { %v560_v48 = vpop.eup %559  ;;  %v284_v51 = vmul.f32 %v558_v45, %v266_v36  ;;  %vm289_vm6 = vweird.f32 %v558_v45 }
  0x45   : > { %v272_v53 = vmul.f32 %v556_v40, %v271_v46  ;;  %v298_v54 = vmul.f32 %v560_v48, %v267_v37  ;;  %vm303_vm8 = vweird.f32 %v560_v48  ;;  %vm290_vm10 = vmor %vm288_vm3, %vm289_vm6 }
  0x46   : > { %v285_v56 = vsub.f32 1.0, %v284_v51  ;;  %v562_v59 = vpop.eup %561  ;;  %vm304_vm11 = vmor %vm302_vm4, %vm303_vm8 }
  0x47   : > { %v273_v60 = vadd.f32 %v556_v40, %v272_v53  ;;  %v299_v62 = vsub.f32 1.0, %v298_v54  ;;  %v312_v1 = vmul.f32 %v562_v59, %v268_v39  ;;  %vm317_vm12 = vweird.f32 %v562_v59 }
  0x48   : > { %v286_v63 = vmul.f32 %v558_v45, %v285_v56  ;;  %vm318_vm14 = vmor %vm316_vm9, %vm317_vm12 }
  0x49   : > { %v277_v2 = vsel %vm841_vm5, %v556_v40, %v273_v60  ;;  %v300_v3 = vmul.f32 %v560_v48, %v299_v62  ;;  %v313_v8 = vsub.f32 1.0, %v312_v1 }
  0x4a   : > { %v282_v6 = vsel %vm837_vm2, %v281_v50, %v277_v2  ;;  %v287_v7 = vadd.f32 %v558_v45, %v286_v63 }
  0x4b   : > { %329 = vst [vmem:[#allocation1] ss:$9 sm:$0xff] %v282_v6  ;;  %v301_v9 = vadd.f32 %v560_v48, %v300_v3  ;;  %v314_v11 = vmul.f32 %v562_v59, %v313_v8 }
  0x4c   : > { %v291_v10 = vsel %vm290_vm10, %v558_v45, %v287_v7 }
  0x4d   : > { %v296_v12 = vsel %vm845_vm7, %v295_v61, %v291_v10  ;;  %v305_v13 = vsel %vm304_vm11, %v560_v48, %v301_v9  ;;  %v315_v16 = vadd.f32 %v562_v59, %v314_v11 }
  0x4e   : > { %331 = vst [vmem:[#allocation1 + $0x1] ss:$9 sm:$0xff] %v296_v12  ;;  %v310_v15 = vsel %vm307_vm13, %v309_v0, %v305_v13 }
  0x4f   : > { %333 = vst [vmem:[#allocation1 + $0x2] ss:$9 sm:$0xff] %v310_v15  ;;  %v319_v17 = vsel %vm318_vm14, %v562_v59, %v315_v16 }
  0x50   : > { %v324_v18 = vsel %vm321_vm15, %v323_v14, %v319_v17 }
  0x51   : > { %335 = vst [vmem:[#allocation1 + $0x3] ss:$9 sm:$0xff] %v324_v18 }
  0x58   : > { %v336_v19 = vld [vmem:[#allocation1] sm:$0xff] }
  0x59   : > { %338 = vst [vmem:[%s226_s15] sm:$0xf] %v336_v19 }
  0x5a   : > { %650 = shalt.err (!%p647_p13)
}
  0x5b   : > { %481 = dma.vmem_to_hbm [thread:$0]  (%p780_p9), %s355_s16, 64, %s357_s18, %s340_s20  }
  0x5c PF: > { %s368_s0 = sand.u32 1, %s689_s9   ;;  %p491_p0 = pnand %p466_p12, %p787_p11 }
  0x5d   : > { %s369_s4 = scalar_lea.sflag [#allocation4], %s368_s0 }
  0x5e   : > { %p492_p1 = pneg %p491_p0 }
  0x60   : > { %684 = dma.done.wait (%p492_p1), %s369_s4, 64  }
  0x61   : > { %686 = vsyncadd (%p492_p1), %s369_s4, 4294967232  ;;  %s21_s14 = sadd.s32 1, %s709_s14   ;;  %s913_s9 = smov %s693_s10 }
  0x62   : > { %p18_p2 = scmp.ge.s32.totalorder %s21_s14, 4   ;;  %s914_s10 = smov %s697_s11 }
  0x63   : > { %s915_s11 = smov %s785_s23  ;;  %s916_s12 = smov %s705_s13 }
  0x64   : > { %s917_s13 = smov %s919_s17  ;;  %20 = sbr.rel (!%p18_p2) target bundleno = 10 (0xa), region = 89 }
  0x69   :  { %375 = vsyncpa [#allocation3], 1 }
  0x6a   :  { %377 = vsyncpa [#allocation3 + $0x1], 1 }
  0x6b   :  { %378 = vsyncpa [#allocation6], 1 }
  0x6c   :  { %380 = vsyncpa [#allocation6 + $0x1], 1 }
  0x6d   :  { %381 = vsyncpa [#allocation4], 1 }
  0x6e   :  { %383 = vsyncpa [#allocation4 + $0x1], 1 }

</bundles_post_ra>
